<compile_context>
chip_gen: v7x
topology: tpu7x:2x2x1
jax: 0.10.0
libtpu: 0.0.40
codegen_flags: <defaults>
</compile_context>

<pallas_src>
import functools

import jax
import jax.numpy as jnp
from jax.experimental import pallas as pl
from jax.experimental.pallas import tpu as pltpu


def _conv_bn_relu_kernel(x_ref, w_ref, bias_ref, o_ref, *,
                         kh, kw, wp, lout, bt):
    """One grid step = `bt` batch elements of the stride-1 conv + BN bias + ReLU.

    x_ref:    (bt, Cin, Lin)      flattened padded NCHW input (compute dtype, VMEM)
    w_ref:    (KH*KW, Cout, Cin)  per-tap conv weight with BN scale folded in (VMEM)
    bias_ref: (Cout, 1)           folded BN bias, f32                        (VMEM)
    o_ref:    (bt, Cout, Lout)    output, Lout = OH*Wp, lane-dense, f32      (VMEM)
    """
    bias = bias_ref[...]
    for b in range(bt):                       # small static batch tile -> unrolled
        acc = None
        for ky in range(kh):
            for kx in range(kw):
                t = ky * kw + kx
                d = ky * wp + kx              # static lane offset of this tap
                x_slc = x_ref[b, :, d:d + lout]            # (Cin, Lout)
                p = jnp.dot(w_ref[t], x_slc,               # (Cout, Lout), f32 acc
                            preferred_element_type=jnp.float32)
                acc = p if acc is None else acc + p
        # Fused BN bias + ReLU on dense (Cout, Lout) vregs, lane-dense f32 store.
        o_ref[b] = jnp.maximum(acc + bias, 0.0).astype(o_ref.dtype)


def my_conv2d_forward(x_nchw, w_oihw, gamma, beta, running_mean, running_var,
                      *, stride=1, padding=0, eps=1e-5,
                      compute_dtype=jnp.bfloat16):
    """Forward pass of MyConv2d. Inputs follow PyTorch conventions (NCHW / OIHW)."""
    n, cin, h, w = x_nchw.shape
    cout, cin_w, kh, kw = w_oihw.shape
    assert cin == cin_w

    hp, wp = h + 2 * padding, w + 2 * padding
    oh1, ow1 = hp - kh + 1, wp - kw + 1            # stride-1 output extents
    assert oh1 > 0 and ow1 > 0
    lout = oh1 * wp                                # flat output incl. kw-1 wrap cols/row
    extra_rows = 1 if kw > 1 else 0                # so tap slices never run off the end
    lin = (hp + extra_rows) * wp

    # ---- BN (eval) folding in f32: scale -> weight, bias kept separate (f32 epilogue). --
    scale = gamma.astype(jnp.float32) / jnp.sqrt(running_var.astype(jnp.float32) + eps)
    bias = (beta.astype(jnp.float32)
            - running_mean.astype(jnp.float32) * scale).reshape(cout, 1)
    # (KH*KW, Cout, Cin) per-tap weight layout; cast to the MXU compute dtype.
    w_taps = (jnp.transpose(w_oihw.astype(jnp.float32), (2, 3, 0, 1))
              .reshape(kh * kw, cout, cin)
              * scale.reshape(1, cout, 1)).astype(compute_dtype)

    # Spatial zero-pad (+1 bottom row when kw>1), flatten H*W onto the lane axis,
    # cast activations to the MXU compute dtype.
    x_flat = jnp.pad(
        x_nchw,
        ((0, 0), (0, 0), (padding, padding + extra_rows), (padding, padding)),
    ).reshape(n, cin, lin).astype(compute_dtype)

    # Batch tile: block several images per grid step (per-image compute is tiny so
    # per-step overhead dominates), bounded by a per-step VMEM budget and capped so
    # the unrolled tap loop stays small.
    in_itemsize = jnp.finfo(compute_dtype).bits // 8
    bytes_per_img = cin * lin * in_itemsize + cout * lout * 4
    budget = 2 * 1024 * 1024
    bt = 1
    for d in range(1, n + 1):
        if n % d == 0 and d <= 8 and d * bytes_per_img <= budget:
            bt = d
    grid = (n // bt,)

    kernel = functools.partial(_conv_bn_relu_kernel,
                               kh=kh, kw=kw, wp=wp, lout=lout, bt=bt)

    flops = 2 * n * cout * kh * kw * cin * oh1 * wp
    bytes_accessed = (x_flat.size * x_flat.dtype.itemsize
                      + w_taps.size * w_taps.dtype.itemsize
                      + bias.size * 4
                      + n * cout * lout * 4)

    out_flat = pl.pallas_call(
        kernel,
        out_shape=jax.ShapeDtypeStruct((n, cout, lout), jnp.float32),
        grid_spec=pltpu.PrefetchScalarGridSpec(
            num_scalar_prefetch=0,
            grid=grid,
            in_specs=[
                pl.BlockSpec((bt, cin, lin), lambda i: (i, 0, 0)),
                pl.BlockSpec((kh * kw, cout, cin), lambda i: (0, 0, 0)),
                pl.BlockSpec((cout, 1), lambda i: (0, 0)),
            ],
            out_specs=pl.BlockSpec((bt, cout, lout), lambda i: (i, 0, 0)),
        ),
        compiler_params=pltpu.CompilerParams(
            dimension_semantics=("parallel",),
            vmem_limit_bytes=32 * 1024 * 1024),
        cost_estimate=pl.CostEstimate(flops=flops, transcendentals=0,
                                      bytes_accessed=bytes_accessed),
    )(x_flat, w_taps, bias)

    # Drop the kw-1 wrap-around columns per output row; the reshape itself is free.
    y = out_flat.reshape(n, cout, oh1, wp)[:, :, :, :ow1]
    if stride > 1:
        y = y[:, :, ::stride, ::stride]
    return y.astype(x_nchw.dtype)


def _reference(x_nchw, w_oihw, gamma, beta, running_mean, running_var,
               *, stride, padding, eps=1e-5):
    """Pure-JAX f32 reference (lax conv) used only for correctness checking."""
    y = jax.lax.conv_general_dilated(
        x_nchw, w_oihw,
        window_strides=(stride, stride),
        padding=[(padding, padding), (padding, padding)],
        dimension_numbers=("NCHW", "OIHW", "NCHW"))
    scale = gamma / jnp.sqrt(running_var + eps)
    bias = beta - running_mean * scale
    y = y * scale[None, :, None, None] + bias[None, :, None, None]
    return jnp.maximum(y, 0.0)


if __name__ == "__main__":
    # MyConv2d(in_channels=4, out_channels=8, kernel_size=3, stride=1, padding=1)
    N, CIN, H, W = 2, 4, 16, 16
    COUT, K, STRIDE, PAD = 8, 3, 1, 1

    key = jax.random.PRNGKey(0)
    kx, kw_, kg, kb, km, kv = jax.random.split(key, 6)

    x = jax.random.normal(kx, (N, CIN, H, W), dtype=jnp.float32)
    w = jax.random.normal(kw_, (COUT, CIN, K, K), dtype=jnp.float32) * 0.1
    gamma = jax.random.uniform(kg, (COUT,), minval=0.5, maxval=1.5,
                               dtype=jnp.float32)
    beta = jax.random.normal(kb, (COUT,), dtype=jnp.float32) * 0.1
    running_mean = jax.random.normal(km, (COUT,), dtype=jnp.float32) * 0.1
    running_var = jax.random.uniform(kv, (COUT,), minval=0.5, maxval=1.5,
                                     dtype=jnp.float32)

    ref = _reference(x, w, gamma, beta, running_mean, running_var,
                     stride=STRIDE, padding=PAD)

    # f32 compute path: tight check against the pure-JAX reference.
    out_f32 = my_conv2d_forward(x, w, gamma, beta, running_mean, running_var,
                                stride=STRIDE, padding=PAD,
                                compute_dtype=jnp.float32)
    out_f32 = jax.block_until_ready(out_f32)
    assert out_f32.shape == (N, COUT, H, W), out_f32.shape
    assert jnp.allclose(out_f32, ref, atol=1e-4, rtol=1e-4), \
        float(jnp.max(jnp.abs(out_f32 - ref)))

    # Default bf16 MXU path (f32 accumulation/epilogue): loose check vs f32 reference.
    out_bf16 = my_conv2d_forward(x, w, gamma, beta, running_mean, running_var,
                                 stride=STRIDE, padding=PAD)
    out_bf16 = jax.block_until_ready(out_bf16)
    assert out_bf16.shape == (N, COUT, H, W), out_bf16.shape
    assert jnp.allclose(out_bf16, ref, atol=5e-2, rtol=5e-2), \
        float(jnp.max(jnp.abs(out_bf16 - ref)))

    print("KERNEL_OK")
</pallas_src>

<mosaic_0001>
module attributes {stable_mosaic.version = 11 : i64} {
  func.func @_conv_bn_relu_kernel(%arg0: i32, %arg1: memref<2x4x342xf32, #tpu.memory_space<vmem>>, %arg2: memref<9x8x4xf32, #tpu.memory_space<vmem>>, %arg3: memref<8x1xf32, #tpu.memory_space<vmem>>, %arg4: memref<2x8x288xf32, #tpu.memory_space<vmem>>) attributes {dimension_semantics = [#tpu.dimension_semantics<parallel>], iteration_bounds = array<i64: 1>, scalar_prefetch = 0 : i64, scratch_operands = 0 : i64, tpu.core_type = #tpu.core_type<tc>, window_params = [{transform_indices = @transform_0, window_bounds = array<i64: 2, 4, 342>}, {pipeline_mode = #tpu.pipeline_mode<synchronous>, transform_indices = @transform_1, window_bounds = array<i64: 9, 8, 4>}, {pipeline_mode = #tpu.pipeline_mode<synchronous>, transform_indices = @transform_2, window_bounds = array<i64: 8, 1>}, {transform_indices = @transform_3, window_bounds = array<i64: 2, 8, 288>}]} {
    %c0 = arith.constant 0 : index
    %c0_0 = arith.constant 0 : index
    %0 = vector.load %arg3[%c0, %c0_0] : memref<8x1xf32, #tpu.memory_space<vmem>>, vector<8x1xf32>
    %c0_1 = arith.constant 0 : index
    %c0_2 = arith.constant 0 : index
    %c0_3 = arith.constant 0 : index
    %1 = vector.load %arg1[%c0_1, %c0_2, %c0_3] : memref<2x4x342xf32, #tpu.memory_space<vmem>>, vector<1x4x288xf32>
    %2 = vector.shape_cast %1 : vector<1x4x288xf32> to vector<4x288xf32>
    %c0_4 = arith.constant 0 : index
    %c0_5 = arith.constant 0 : index
    %c0_6 = arith.constant 0 : index
    %3 = vector.load %arg2[%c0_4, %c0_5, %c0_6] : memref<9x8x4xf32, #tpu.memory_space<vmem>>, vector<1x8x4xf32>
    %4 = vector.shape_cast %3 : vector<1x8x4xf32> to vector<8x4xf32>
    %cst = arith.constant dense<0.000000e+00> : vector<8x288xf32>
    %5 = tpu.matmul %4, %2, %cst {dimension_numbers = #tpu.dot_dimension_numbers<[1], [0], [0], [1], [0, 0, 1, 1], [], []>} : vector<8x4xf32>, vector<4x288xf32>, vector<8x288xf32> -> vector<8x288xf32>
    %c0_7 = arith.constant 0 : index
    %c0_8 = arith.constant 0 : index
    %c1 = arith.constant 1 : index
    %6 = vector.load %arg1[%c0_7, %c0_8, %c1] : memref<2x4x342xf32, #tpu.memory_space<vmem>>, vector<1x4x288xf32>
    %7 = vector.shape_cast %6 : vector<1x4x288xf32> to vector<4x288xf32>
    %c1_9 = arith.constant 1 : index
    %c0_10 = arith.constant 0 : index
    %c0_11 = arith.constant 0 : index
    %8 = vector.load %arg2[%c1_9, %c0_10, %c0_11] : memref<9x8x4xf32, #tpu.memory_space<vmem>>, vector<1x8x4xf32>
    %9 = vector.shape_cast %8 : vector<1x8x4xf32> to vector<8x4xf32>
    %cst_12 = arith.constant dense<0.000000e+00> : vector<8x288xf32>
    %10 = tpu.matmul %9, %7, %cst_12 {dimension_numbers = #tpu.dot_dimension_numbers<[1], [0], [0], [1], [0, 0, 1, 1], [], []>} : vector<8x4xf32>, vector<4x288xf32>, vector<8x288xf32> -> vector<8x288xf32>
    %11 = arith.addf %5, %10 : vector<8x288xf32>
    %c0_13 = arith.constant 0 : index
    %c0_14 = arith.constant 0 : index
    %c2 = arith.constant 2 : index
    %12 = vector.load %arg1[%c0_13, %c0_14, %c2] : memref<2x4x342xf32, #tpu.memory_space<vmem>>, vector<1x4x288xf32>
    %13 = vector.shape_cast %12 : vector<1x4x288xf32> to vector<4x288xf32>
    %c2_15 = arith.constant 2 : index
    %c0_16 = arith.constant 0 : index
    %c0_17 = arith.constant 0 : index
    %14 = vector.load %arg2[%c2_15, %c0_16, %c0_17] : memref<9x8x4xf32, #tpu.memory_space<vmem>>, vector<1x8x4xf32>
    %15 = vector.shape_cast %14 : vector<1x8x4xf32> to vector<8x4xf32>
    %cst_18 = arith.constant dense<0.000000e+00> : vector<8x288xf32>
    %16 = tpu.matmul %15, %13, %cst_18 {dimension_numbers = #tpu.dot_dimension_numbers<[1], [0], [0], [1], [0, 0, 1, 1], [], []>} : vector<8x4xf32>, vector<4x288xf32>, vector<8x288xf32> -> vector<8x288xf32>
    %17 = arith.addf %11, %16 : vector<8x288xf32>
    %c0_19 = arith.constant 0 : index
    %c0_20 = arith.constant 0 : index
    %c18 = arith.constant 18 : index
    %18 = vector.load %arg1[%c0_19, %c0_20, %c18] : memref<2x4x342xf32, #tpu.memory_space<vmem>>, vector<1x4x288xf32>
    %19 = vector.shape_cast %18 : vector<1x4x288xf32> to vector<4x288xf32>
    %c3 = arith.constant 3 : index
    %c0_21 = arith.constant 0 : index
    %c0_22 = arith.constant 0 : index
    %20 = vector.load %arg2[%c3, %c0_21, %c0_22] : memref<9x8x4xf32, #tpu.memory_space<vmem>>, vector<1x8x4xf32>
    %21 = vector.shape_cast %20 : vector<1x8x4xf32> to vector<8x4xf32>
    %cst_23 = arith.constant dense<0.000000e+00> : vector<8x288xf32>
    %22 = tpu.matmul %21, %19, %cst_23 {dimension_numbers = #tpu.dot_dimension_numbers<[1], [0], [0], [1], [0, 0, 1, 1], [], []>} : vector<8x4xf32>, vector<4x288xf32>, vector<8x288xf32> -> vector<8x288xf32>
    %23 = arith.addf %17, %22 : vector<8x288xf32>
    %c0_24 = arith.constant 0 : index
    %c0_25 = arith.constant 0 : index
    %c19 = arith.constant 19 : index
    %24 = vector.load %arg1[%c0_24, %c0_25, %c19] : memref<2x4x342xf32, #tpu.memory_space<vmem>>, vector<1x4x288xf32>
    %25 = vector.shape_cast %24 : vector<1x4x288xf32> to vector<4x288xf32>
    %c4 = arith.constant 4 : index
    %c0_26 = arith.constant 0 : index
    %c0_27 = arith.constant 0 : index
    %26 = vector.load %arg2[%c4, %c0_26, %c0_27] : memref<9x8x4xf32, #tpu.memory_space<vmem>>, vector<1x8x4xf32>
    %27 = vector.shape_cast %26 : vector<1x8x4xf32> to vector<8x4xf32>
    %cst_28 = arith.constant dense<0.000000e+00> : vector<8x288xf32>
    %28 = tpu.matmul %27, %25, %cst_28 {dimension_numbers = #tpu.dot_dimension_numbers<[1], [0], [0], [1], [0, 0, 1, 1], [], []>} : vector<8x4xf32>, vector<4x288xf32>, vector<8x288xf32> -> vector<8x288xf32>
    %29 = arith.addf %23, %28 : vector<8x288xf32>
    %c0_29 = arith.constant 0 : index
    %c0_30 = arith.constant 0 : index
    %c20 = arith.constant 20 : index
    %30 = vector.load %arg1[%c0_29, %c0_30, %c20] : memref<2x4x342xf32, #tpu.memory_space<vmem>>, vector<1x4x288xf32>
    %31 = vector.shape_cast %30 : vector<1x4x288xf32> to vector<4x288xf32>
    %c5 = arith.constant 5 : index
    %c0_31 = arith.constant 0 : index
    %c0_32 = arith.constant 0 : index
    %32 = vector.load %arg2[%c5, %c0_31, %c0_32] : memref<9x8x4xf32, #tpu.memory_space<vmem>>, vector<1x8x4xf32>
    %33 = vector.shape_cast %32 : vector<1x8x4xf32> to vector<8x4xf32>
    %cst_33 = arith.constant dense<0.000000e+00> : vector<8x288xf32>
    %34 = tpu.matmul %33, %31, %cst_33 {dimension_numbers = #tpu.dot_dimension_numbers<[1], [0], [0], [1], [0, 0, 1, 1], [], []>} : vector<8x4xf32>, vector<4x288xf32>, vector<8x288xf32> -> vector<8x288xf32>
    %35 = arith.addf %29, %34 : vector<8x288xf32>
    %c0_34 = arith.constant 0 : index
    %c0_35 = arith.constant 0 : index
    %c36 = arith.constant 36 : index
    %36 = vector.load %arg1[%c0_34, %c0_35, %c36] : memref<2x4x342xf32, #tpu.memory_space<vmem>>, vector<1x4x288xf32>
    %37 = vector.shape_cast %36 : vector<1x4x288xf32> to vector<4x288xf32>
    %c6 = arith.constant 6 : index
    %c0_36 = arith.constant 0 : index
    %c0_37 = arith.constant 0 : index
    %38 = vector.load %arg2[%c6, %c0_36, %c0_37] : memref<9x8x4xf32, #tpu.memory_space<vmem>>, vector<1x8x4xf32>
    %39 = vector.shape_cast %38 : vector<1x8x4xf32> to vector<8x4xf32>
    %cst_38 = arith.constant dense<0.000000e+00> : vector<8x288xf32>
    %40 = tpu.matmul %39, %37, %cst_38 {dimension_numbers = #tpu.dot_dimension_numbers<[1], [0], [0], [1], [0, 0, 1, 1], [], []>} : vector<8x4xf32>, vector<4x288xf32>, vector<8x288xf32> -> vector<8x288xf32>
    %41 = arith.addf %35, %40 : vector<8x288xf32>
    %c0_39 = arith.constant 0 : index
    %c0_40 = arith.constant 0 : index
    %c37 = arith.constant 37 : index
    %42 = vector.load %arg1[%c0_39, %c0_40, %c37] : memref<2x4x342xf32, #tpu.memory_space<vmem>>, vector<1x4x288xf32>
    %43 = vector.shape_cast %42 : vector<1x4x288xf32> to vector<4x288xf32>
    %c7 = arith.constant 7 : index
    %c0_41 = arith.constant 0 : index
    %c0_42 = arith.constant 0 : index
    %44 = vector.load %arg2[%c7, %c0_41, %c0_42] : memref<9x8x4xf32, #tpu.memory_space<vmem>>, vector<1x8x4xf32>
    %45 = vector.shape_cast %44 : vector<1x8x4xf32> to vector<8x4xf32>
    %cst_43 = arith.constant dense<0.000000e+00> : vector<8x288xf32>
    %46 = tpu.matmul %45, %43, %cst_43 {dimension_numbers = #tpu.dot_dimension_numbers<[1], [0], [0], [1], [0, 0, 1, 1], [], []>} : vector<8x4xf32>, vector<4x288xf32>, vector<8x288xf32> -> vector<8x288xf32>
    %47 = arith.addf %41, %46 : vector<8x288xf32>
    %c0_44 = arith.constant 0 : index
    %c0_45 = arith.constant 0 : index
    %c38 = arith.constant 38 : index
    %48 = vector.load %arg1[%c0_44, %c0_45, %c38] : memref<2x4x342xf32, #tpu.memory_space<vmem>>, vector<1x4x288xf32>
    %49 = vector.shape_cast %48 : vector<1x4x288xf32> to vector<4x288xf32>
    %c8 = arith.constant 8 : index
    %c0_46 = arith.constant 0 : index
    %c0_47 = arith.constant 0 : index
    %50 = vector.load %arg2[%c8, %c0_46, %c0_47] : memref<9x8x4xf32, #tpu.memory_space<vmem>>, vector<1x8x4xf32>
    %51 = vector.shape_cast %50 : vector<1x8x4xf32> to vector<8x4xf32>
    %cst_48 = arith.constant dense<0.000000e+00> : vector<8x288xf32>
    %52 = tpu.matmul %51, %49, %cst_48 {dimension_numbers = #tpu.dot_dimension_numbers<[1], [0], [0], [1], [0, 0, 1, 1], [], []>} : vector<8x4xf32>, vector<4x288xf32>, vector<8x288xf32> -> vector<8x288xf32>
    %53 = arith.addf %47, %52 : vector<8x288xf32>
    %54 = vector.broadcast %0 : vector<8x1xf32> to vector<8x288xf32>
    %55 = arith.addf %53, %54 : vector<8x288xf32>
    %cst_49 = arith.constant 0.000000e+00 : f32
    %56 = vector.broadcast %cst_49 : f32 to vector<8x288xf32>
    %57 = arith.maximumf %55, %56 : vector<8x288xf32>
    %c0_50 = arith.constant 0 : index
    %c0_51 = arith.constant 0 : index
    %c0_52 = arith.constant 0 : index
    %58 = vector.load %arg4[%c0_50, %c0_51, %c0_52] : memref<2x8x288xf32, #tpu.memory_space<vmem>>, vector<1x8x288xf32>
    %59 = vector.shape_cast %58 : vector<1x8x288xf32> to vector<8x288xf32>
    %60 = vector.shape_cast %57 : vector<8x288xf32> to vector<1x8x288xf32>
    tpu.vector_store %arg4[%c0_50, %c0_51, %c0_52], %60 {strides = array<i32>} : memref<2x8x288xf32, #tpu.memory_space<vmem>>, vector<1x8x288xf32>,
    %c1_53 = arith.constant 1 : index
    %c0_54 = arith.constant 0 : index
    %c0_55 = arith.constant 0 : index
    %61 = vector.load %arg1[%c1_53, %c0_54, %c0_55] : memref<2x4x342xf32, #tpu.memory_space<vmem>>, vector<1x4x288xf32>
    %62 = vector.shape_cast %61 : vector<1x4x288xf32> to vector<4x288xf32>
    %c0_56 = arith.constant 0 : index
    %c0_57 = arith.constant 0 : index
    %c0_58 = arith.constant 0 : index
    %63 = vector.load %arg2[%c0_56, %c0_57, %c0_58] : memref<9x8x4xf32, #tpu.memory_space<vmem>>, vector<1x8x4xf32>
    %64 = vector.shape_cast %63 : vector<1x8x4xf32> to vector<8x4xf32>
    %cst_59 = arith.constant dense<0.000000e+00> : vector<8x288xf32>
    %65 = tpu.matmul %64, %62, %cst_59 {dimension_numbers = #tpu.dot_dimension_numbers<[1], [0], [0], [1], [0, 0, 1, 1], [], []>} : vector<8x4xf32>, vector<4x288xf32>, vector<8x288xf32> -> vector<8x288xf32>
    %c1_60 = arith.constant 1 : index
    %c0_61 = arith.constant 0 : index
    %c1_62 = arith.constant 1 : index
    %66 = vector.load %arg1[%c1_60, %c0_61, %c1_62] : memref<2x4x342xf32, #tpu.memory_space<vmem>>, vector<1x4x288xf32>
    %67 = vector.shape_cast %66 : vector<1x4x288xf32> to vector<4x288xf32>
    %c1_63 = arith.constant 1 : index
    %c0_64 = arith.constant 0 : index
    %c0_65 = arith.constant 0 : index
    %68 = vector.load %arg2[%c1_63, %c0_64, %c0_65] : memref<9x8x4xf32, #tpu.memory_space<vmem>>, vector<1x8x4xf32>
    %69 = vector.shape_cast %68 : vector<1x8x4xf32> to vector<8x4xf32>
    %cst_66 = arith.constant dense<0.000000e+00> : vector<8x288xf32>
    %70 = tpu.matmul %69, %67, %cst_66 {dimension_numbers = #tpu.dot_dimension_numbers<[1], [0], [0], [1], [0, 0, 1, 1], [], []>} : vector<8x4xf32>, vector<4x288xf32>, vector<8x288xf32> -> vector<8x288xf32>
    %71 = arith.addf %65, %70 : vector<8x288xf32>
    %c1_67 = arith.constant 1 : index
    %c0_68 = arith.constant 0 : index
    %c2_69 = arith.constant 2 : index
    %72 = vector.load %arg1[%c1_67, %c0_68, %c2_69] : memref<2x4x342xf32, #tpu.memory_space<vmem>>, vector<1x4x288xf32>
    %73 = vector.shape_cast %72 : vector<1x4x288xf32> to vector<4x288xf32>
    %c2_70 = arith.constant 2 : index
    %c0_71 = arith.constant 0 : index
    %c0_72 = arith.constant 0 : index
    %74 = vector.load %arg2[%c2_70, %c0_71, %c0_72] : memref<9x8x4xf32, #tpu.memory_space<vmem>>, vector<1x8x4xf32>
    %75 = vector.shape_cast %74 : vector<1x8x4xf32> to vector<8x4xf32>
    %cst_73 = arith.constant dense<0.000000e+00> : vector<8x288xf32>
    %76 = tpu.matmul %75, %73, %cst_73 {dimension_numbers = #tpu.dot_dimension_numbers<[1], [0], [0], [1], [0, 0, 1, 1], [], []>} : vector<8x4xf32>, vector<4x288xf32>, vector<8x288xf32> -> vector<8x288xf32>
    %77 = arith.addf %71, %76 : vector<8x288xf32>
    %c1_74 = arith.constant 1 : index
    %c0_75 = arith.constant 0 : index
    %c18_76 = arith.constant 18 : index
    %78 = vector.load %arg1[%c1_74, %c0_75, %c18_76] : memref<2x4x342xf32, #tpu.memory_space<vmem>>, vector<1x4x288xf32>
    %79 = vector.shape_cast %78 : vector<1x4x288xf32> to vector<4x288xf32>
    %c3_77 = arith.constant 3 : index
    %c0_78 = arith.constant 0 : index
    %c0_79 = arith.constant 0 : index
    %80 = vector.load %arg2[%c3_77, %c0_78, %c0_79] : memref<9x8x4xf32, #tpu.memory_space<vmem>>, vector<1x8x4xf32>
    %81 = vector.shape_cast %80 : vector<1x8x4xf32> to vector<8x4xf32>
    %cst_80 = arith.constant dense<0.000000e+00> : vector<8x288xf32>
    %82 = tpu.matmul %81, %79, %cst_80 {dimension_numbers = #tpu.dot_dimension_numbers<[1], [0], [0], [1], [0, 0, 1, 1], [], []>} : vector<8x4xf32>, vector<4x288xf32>, vector<8x288xf32> -> vector<8x288xf32>
    %83 = arith.addf %77, %82 : vector<8x288xf32>
    %c1_81 = arith.constant 1 : index
    %c0_82 = arith.constant 0 : index
    %c19_83 = arith.constant 19 : index
    %84 = vector.load %arg1[%c1_81, %c0_82, %c19_83] : memref<2x4x342xf32, #tpu.memory_space<vmem>>, vector<1x4x288xf32>
    %85 = vector.shape_cast %84 : vector<1x4x288xf32> to vector<4x288xf32>
    %c4_84 = arith.constant 4 : index
    %c0_85 = arith.constant 0 : index
    %c0_86 = arith.constant 0 : index
    %86 = vector.load %arg2[%c4_84, %c0_85, %c0_86] : memref<9x8x4xf32, #tpu.memory_space<vmem>>, vector<1x8x4xf32>
    %87 = vector.shape_cast %86 : vector<1x8x4xf32> to vector<8x4xf32>
    %cst_87 = arith.constant dense<0.000000e+00> : vector<8x288xf32>
    %88 = tpu.matmul %87, %85, %cst_87 {dimension_numbers = #tpu.dot_dimension_numbers<[1], [0], [0], [1], [0, 0, 1, 1], [], []>} : vector<8x4xf32>, vector<4x288xf32>, vector<8x288xf32> -> vector<8x288xf32>
    %89 = arith.addf %83, %88 : vector<8x288xf32>
    %c1_88 = arith.constant 1 : index
    %c0_89 = arith.constant 0 : index
    %c20_90 = arith.constant 20 : index
    %90 = vector.load %arg1[%c1_88, %c0_89, %c20_90] : memref<2x4x342xf32, #tpu.memory_space<vmem>>, vector<1x4x288xf32>
    %91 = vector.shape_cast %90 : vector<1x4x288xf32> to vector<4x288xf32>
    %c5_91 = arith.constant 5 : index
    %c0_92 = arith.constant 0 : index
    %c0_93 = arith.constant 0 : index
    %92 = vector.load %arg2[%c5_91, %c0_92, %c0_93] : memref<9x8x4xf32, #tpu.memory_space<vmem>>, vector<1x8x4xf32>
    %93 = vector.shape_cast %92 : vector<1x8x4xf32> to vector<8x4xf32>
    %cst_94 = arith.constant dense<0.000000e+00> : vector<8x288xf32>
    %94 = tpu.matmul %93, %91, %cst_94 {dimension_numbers = #tpu.dot_dimension_numbers<[1], [0], [0], [1], [0, 0, 1, 1], [], []>} : vector<8x4xf32>, vector<4x288xf32>, vector<8x288xf32> -> vector<8x288xf32>
    %95 = arith.addf %89, %94 : vector<8x288xf32>
    %c1_95 = arith.constant 1 : index
    %c0_96 = arith.constant 0 : index
    %c36_97 = arith.constant 36 : index
    %96 = vector.load %arg1[%c1_95, %c0_96, %c36_97] : memref<2x4x342xf32, #tpu.memory_space<vmem>>, vector<1x4x288xf32>
    %97 = vector.shape_cast %96 : vector<1x4x288xf32> to vector<4x288xf32>
    %c6_98 = arith.constant 6 : index
    %c0_99 = arith.constant 0 : index
    %c0_100 = arith.constant 0 : index
    %98 = vector.load %arg2[%c6_98, %c0_99, %c0_100] : memref<9x8x4xf32, #tpu.memory_space<vmem>>, vector<1x8x4xf32>
    %99 = vector.shape_cast %98 : vector<1x8x4xf32> to vector<8x4xf32>
    %cst_101 = arith.constant dense<0.000000e+00> : vector<8x288xf32>
    %100 = tpu.matmul %99, %97, %cst_101 {dimension_numbers = #tpu.dot_dimension_numbers<[1], [0], [0], [1], [0, 0, 1, 1], [], []>} : vector<8x4xf32>, vector<4x288xf32>, vector<8x288xf32> -> vector<8x288xf32>
    %101 = arith.addf %95, %100 : vector<8x288xf32>
    %c1_102 = arith.constant 1 : index
    %c0_103 = arith.constant 0 : index
    %c37_104 = arith.constant 37 : index
    %102 = vector.load %arg1[%c1_102, %c0_103, %c37_104] : memref<2x4x342xf32, #tpu.memory_space<vmem>>, vector<1x4x288xf32>
    %103 = vector.shape_cast %102 : vector<1x4x288xf32> to vector<4x288xf32>
    %c7_105 = arith.constant 7 : index
    %c0_106 = arith.constant 0 : index
    %c0_107 = arith.constant 0 : index
    %104 = vector.load %arg2[%c7_105, %c0_106, %c0_107] : memref<9x8x4xf32, #tpu.memory_space<vmem>>, vector<1x8x4xf32>
    %105 = vector.shape_cast %104 : vector<1x8x4xf32> to vector<8x4xf32>
    %cst_108 = arith.constant dense<0.000000e+00> : vector<8x288xf32>
    %106 = tpu.matmul %105, %103, %cst_108 {dimension_numbers = #tpu.dot_dimension_numbers<[1], [0], [0], [1], [0, 0, 1, 1], [], []>} : vector<8x4xf32>, vector<4x288xf32>, vector<8x288xf32> -> vector<8x288xf32>
    %107 = arith.addf %101, %106 : vector<8x288xf32>
    %c1_109 = arith.constant 1 : index
    %c0_110 = arith.constant 0 : index
    %c38_111 = arith.constant 38 : index
    %108 = vector.load %arg1[%c1_109, %c0_110, %c38_111] : memref<2x4x342xf32, #tpu.memory_space<vmem>>, vector<1x4x288xf32>
    %109 = vector.shape_cast %108 : vector<1x4x288xf32> to vector<4x288xf32>
    %c8_112 = arith.constant 8 : index
    %c0_113 = arith.constant 0 : index
    %c0_114 = arith.constant 0 : index
    %110 = vector.load %arg2[%c8_112, %c0_113, %c0_114] : memref<9x8x4xf32, #tpu.memory_space<vmem>>, vector<1x8x4xf32>
    %111 = vector.shape_cast %110 : vector<1x8x4xf32> to vector<8x4xf32>
    %cst_115 = arith.constant dense<0.000000e+00> : vector<8x288xf32>
    %112 = tpu.matmul %111, %109, %cst_115 {dimension_numbers = #tpu.dot_dimension_numbers<[1], [0], [0], [1], [0, 0, 1, 1], [], []>} : vector<8x4xf32>, vector<4x288xf32>, vector<8x288xf32> -> vector<8x288xf32>
    %113 = arith.addf %107, %112 : vector<8x288xf32>
    %114 = vector.broadcast %0 : vector<8x1xf32> to vector<8x288xf32>
    %115 = arith.addf %113, %114 : vector<8x288xf32>
    %cst_116 = arith.constant 0.000000e+00 : f32
    %116 = vector.broadcast %cst_116 : f32 to vector<8x288xf32>
    %117 = arith.maximumf %115, %116 : vector<8x288xf32>
    %c1_117 = arith.constant 1 : index
    %c0_118 = arith.constant 0 : index
    %c0_119 = arith.constant 0 : index
    %118 = vector.load %arg4[%c1_117, %c0_118, %c0_119] : memref<2x8x288xf32, #tpu.memory_space<vmem>>, vector<1x8x288xf32>
    %119 = vector.shape_cast %118 : vector<1x8x288xf32> to vector<8x288xf32>
    %120 = vector.shape_cast %117 : vector<8x288xf32> to vector<1x8x288xf32>
    tpu.vector_store %arg4[%c1_117, %c0_118, %c0_119], %120 {strides = array<i32>} : memref<2x8x288xf32, #tpu.memory_space<vmem>>, vector<1x8x288xf32>,
    return
  }
  func.func @transform_0(%arg0: i32) -> (i32, i32, i32) {
    %c0_i32 = arith.constant 0 : i32
    %c0_i32_0 = arith.constant 0 : i32
    %c0_i32_1 = arith.constant 0 : i32
    return %arg0, %c0_i32, %c0_i32_0 : i32, i32, i32
  }
  func.func @transform_1(%arg0: i32) -> (i32, i32, i32) {
    %c0_i32 = arith.constant 0 : i32
    %c0_i32_0 = arith.constant 0 : i32
    %c0_i32_1 = arith.constant 0 : i32
    %c0_i32_2 = arith.constant 0 : i32
    return %c0_i32, %c0_i32_0, %c0_i32_1 : i32, i32, i32
  }
  func.func @transform_2(%arg0: i32) -> (i32, i32) {
    %c0_i32 = arith.constant 0 : i32
    %c0_i32_0 = arith.constant 0 : i32
    %c0_i32_1 = arith.constant 0 : i32
    return %c0_i32, %c0_i32_0 : i32, i32
  }
  func.func @transform_3(%arg0: i32) -> (i32, i32, i32) {
    %c0_i32 = arith.constant 0 : i32
    %c0_i32_0 = arith.constant 0 : i32
    %c0_i32_1 = arith.constant 0 : i32
    return %arg0, %c0_i32, %c0_i32_0 : i32, i32, i32
  }
}

</mosaic_0001>

<bundles_post_ra>
// kernel: tpu_custom_call.1
= control target key start
LH: loop header
LB: loop body
LE: loop exit
PB: predicated region body
PF: predicated region fallthrough
CT: control target
= control target key end

     0   :  { %s3365_s14 = smov 127   ;;  %s3366_s17 = smov 126   ;;  %v3367_v3 = vmov 0.0   ;;  %vm3368_vm0 = vmmov 0   ;;  %s3853_s0 = inlined_call_operand.vmem [shape: f32[2,4,342], index: 0, kind: input, shape index: {}]   ;;  %s3854_s1 = inlined_call_operand.vmem [shape: f32[9,8,4], index: 1, kind: input, shape index: {}]   ;;  %s3855_s2 = inlined_call_operand.vmem [shape: f32[8,1], index: 2, kind: input, shape index: {}]   ;;  %s3856_s3 = inlined_call_operand.hbm [shape: f32[2,8,288], index: 3, kind: output, shape index: {}]  }
   0x1   :  { %v3402_v0 = vld [vmem:[%s3853_s0] sm:$0xff]  ;;  %v3415_v2 = vld [vmem:[%s3853_s0 + $0x8] sm:$0xf]  ;;  %3202 = vmatprep.subr.mxu1 %v3367_v3  ;;  %108 = vmatprep.mubr.f32.mxu0 %v3367_v3 }
   0x2   :  { %24 = vrot.lane.b32.xlu1 %v3402_v0, %s3365_s14  ;;  %v3408_v1 = vcombine.high %v3402_v0, %v3402_v0  ;;  %v336_v4 = vld [vmem:[%s3853_s0 + $0x8] sm:$0xf]  ;;  %3204 = vmatprep.mubr.msk.f32.mxu1 %vm3368_vm0, %v3367_v3 }
   0x4   :  { %26 = vrot.lane.b32.xlu0 %v3408_v1, %s3365_s14 }
   0x6   :  { %344 = vrot.lane.b32.xlu1 %v3408_v1, %s3366_s17 }
   0x8   :  { %28 = vrot.lane.b32.xlu0 %v3415_v2, %s3365_s14 }
   0x9   :  { %8 = vsyncpa [#allocation3], 0  ;;  %v505_v5 = vld [vmem:[%s3853_s0 + $0x8] sm:$0xf]  ;;  %s3369_s22 = smov 110   ;;  %s3370_s23 = smov 109  }
   0xa   :  { %342 = vrot.lane.b32.xlu1 %v3402_v0, %s3366_s17  ;;  %v674_v6 = vld [vmem:[%s3853_s0 + $0x8] sm:$0xf]  ;;  %s3371_s28 = smov 108   ;;  %s3372_s29 = smov 92   ;;  %v3479_v11 = vld [vmem:[%s3853_s0 + $0xc] sm:$0xff]  ;;  %vm37_vm1 = vcmask 1043456  }
   0xb   :  { %v843_v7 = vld [vmem:[%s3853_s0 + $0x8] sm:$0xf]  ;;  %s3373_s7 = smov 91   ;;  %s3374_s8 = smov 90   ;;  %v3486_v12 = vld [vmem:[%s3853_s0 + $0x14] sm:$0xf]  ;;  %v3491_v13 = vcombine.high %v3479_v11, %v3479_v11 }
   0xc   :  { %346 = vrot.lane.b32.xlu0 %v336_v4, %s3366_s17  ;;  %v1012_v8 = vld [vmem:[%s3853_s0 + $0x8] sm:$0xf]  ;;  %v3111_v14 = vld [vmem:[%s3853_s0 + $0x14] sm:$0xf]  ;;  %vm30_vm2 = vcmask 1039360   ;;  %vm33_vm3 = vcmask 31744  }
   0xd   :  { %v1181_v9 = vld [vmem:[%s3853_s0 + $0x8] sm:$0xf]  ;;  %v3119_v15 = vld [vmem:[%s3853_s0 + $0x14] sm:$0xf]  ;;  %vm348_vm4 = vcmask 1031168   ;;  %v3585_v32 = vld [vmem:[%s3854_s1] sm:$0xff] }
   0xe   :  { %515 = vrot.lane.b32.xlu1 %v505_v5, %s3369_s22  ;;  %v1350_v10 = vld [vmem:[%s3853_s0 + $0x8] sm:$0xf]  ;;  %v3127_v16 = vld [vmem:[%s3853_s0 + $0x14] sm:$0xf]  ;;  %vm517_vm5 = vcmask 900096   ;;  %v15_v34 = vld [vmem:[%s3855_s2] sm:$0xff] }
   0xf   :  { %v3135_v17 = vld [vmem:[%s3853_s0 + $0x14] sm:$0xf]  ;;  %v3560_v26 = vld [vmem:[%s3854_s1 + $0x8] sm:$0xff]  ;;  %v3375_v37 = vmov 0   ;;  %v3617_v42 = vld [vmem:[%s3854_s1 + $0x18] sm:$0xff]  ;;  %vm686_vm6 = vcmask 891904  }
  0x10   :  { %513 = vrot.lane.b32.xlu0 %v3408_v1, %s3369_s22  ;;  %v3143_v18 = vld [vmem:[%s3853_s0 + $0x14] sm:$0xf]  ;;  %v3630_v47 = vld [vmem:[%s3854_s1 + $0x20] sm:$0xff]  ;;  %v3646_v50 = vld [vmem:[%s3854_s1 + $0x28] sm:$0xff]  ;;  %vm855_vm7 = vcmask 883712   ;;  %vm1024_vm8 = vcmask 752640  }
  0x11   :  { %v3151_v19 = vld [vmem:[%s3853_s0 + $0x14] sm:$0xf]  ;;  %3338 = vset.pattern.permute.xlu0 %v3375_v37  ;;  %v3676_v61 = vld [vmem:[%s3854_s1 + $0x38] sm:$0xff]  ;;  %vm1193_vm9 = vcmask 744448   ;;  %vm1362_vm10 = vcmask 736256   ;;  %vm1531_vm11 = vcmask 261120  }
  0x12   :  { %682 = vrot.lane.b32.xlu1 %v3408_v1, %s3370_s23  ;;  %v3159_v20 = vld [vmem:[%s3853_s0 + $0x14] sm:$0xf] }
  0x13   :  { %v3601_v39 = vld [vmem:[%s3854_s1 + $0x10] sm:$0xff] }
  0x14   :  { %511 = vrot.lane.b32.xlu0 %v3402_v0, %s3369_s22  ;;  %v3663_v57 = vld [vmem:[%s3854_s1 + $0x30] sm:$0xff] }
  0x16   :  { %680 = vrot.lane.b32.xlu1 %v3402_v0, %s3370_s23 }
  0x18   :  { %684 = vrot.lane.b32.xlu0 %v674_v6, %s3370_s23 }
  0x1a   :  { %853 = vrot.lane.b32.xlu1 %v843_v7, %s3371_s28 }
  0x1c   :  { %851 = vrot.lane.b32.xlu0 %v3408_v1, %s3371_s28 }
  0x1e   :  { %1020 = vrot.lane.b32.xlu1 %v3408_v1, %s3372_s29 }
  0x20   :  { %849 = vrot.lane.b32.xlu0 %v3402_v0, %s3371_s28 }
  0x22   :  { %1018 = vrot.lane.b32.xlu1 %v3402_v0, %s3372_s29 }
  0x24   :  { %1022 = vrot.lane.b32.xlu0 %v1012_v8, %s3372_s29 }
  0x26   :  { %1191 = vrot.lane.b32.xlu1 %v1181_v9, %s3373_s7 }
  0x28   :  { %1189 = vrot.lane.b32.xlu0 %v3408_v1, %s3373_s7 }
  0x2a   :  { %1358 = vrot.lane.b32.xlu1 %v3408_v1, %s3374_s8 }
  0x2c   :  { %1187 = vrot.lane.b32.xlu0 %v3402_v0, %s3373_s7 }
  0x2e   :  { %1356 = vrot.lane.b32.xlu1 %v3402_v0, %s3374_s8 }
  0x30   :  { %1360 = vrot.lane.b32.xlu0 %v1350_v10, %s3374_s8 }
  0x32   :  { %1545 = vrot.lane.b32.xlu1 %v3486_v12, %s3365_s14 }
  0x34   :  { %1543 = vrot.lane.b32.xlu0 %v3491_v13, %s3365_s14 }
  0x36   :  { %1857 = vrot.lane.b32.xlu1 %v3491_v13, %s3366_s17 }
  0x38   :  { %1541 = vrot.lane.b32.xlu0 %v3479_v11, %s3365_s14 }
  0x3a   :  { %1855 = vrot.lane.b32.xlu1 %v3479_v11, %s3366_s17 }
  0x3c   :  { %1859 = vrot.lane.b32.xlu0 %v3111_v14, %s3366_s17 }
  0x3e   :  { %2026 = vrot.lane.b32.xlu1 %v3119_v15, %s3369_s22 }
  0x40   :  { %2024 = vrot.lane.b32.xlu0 %v3491_v13, %s3369_s22 }
  0x42   :  { %2191 = vrot.lane.b32.xlu1 %v3491_v13, %s3370_s23 }
  0x44   :  { %2022 = vrot.lane.b32.xlu0 %v3479_v11, %s3369_s22 }
  0x46   :  { %2189 = vrot.lane.b32.xlu1 %v3479_v11, %s3370_s23 }
  0x48   :  { %2193 = vrot.lane.b32.xlu0 %v3127_v16, %s3370_s23 }
  0x4a   :  { %2360 = vrot.lane.b32.xlu1 %v3135_v17, %s3371_s28 }
  0x4c   :  { %2358 = vrot.lane.b32.xlu0 %v3491_v13, %s3371_s28 }
  0x4e   :  { %2525 = vrot.lane.b32.xlu1 %v3491_v13, %s3372_s29 }
  0x50   :  { %2356 = vrot.lane.b32.xlu0 %v3479_v11, %s3371_s28 }
  0x52   :  { %2523 = vrot.lane.b32.xlu1 %v3479_v11, %s3372_s29 }
  0x54   :  { %2527 = vrot.lane.b32.xlu0 %v3143_v18, %s3372_s29 }
  0x56   :  { %2694 = vrot.lane.b32.xlu1 %v3151_v19, %s3373_s7 }
  0x58   :  { %2692 = vrot.lane.b32.xlu0 %v3491_v13, %s3373_s7 }
  0x5a   :  { %2859 = vrot.lane.b32.xlu1 %v3491_v13, %s3374_s8 }
  0x5c   :  { %2690 = vrot.lane.b32.xlu0 %v3479_v11, %s3373_s7 }
  0x5e   :  { %2857 = vrot.lane.b32.xlu1 %v3479_v11, %s3374_s8 }
  0x60   :  { %2861 = vrot.lane.b32.xlu0 %v3159_v20, %s3374_s8 }
  0x64   :  { %1520 = vperm.xlu0 %3338, %v15_v34  }
  0x74   :  { %v25_v21 = vpop.permute.xlu1 %24 }
  0x76   :  { %v27_v22 = vpop.permute.xlu0 %26 }
  0x77   :  { %v31_v27 = vsel %vm30_vm2, %v25_v21, %v27_v22 }
  0x78   :  { %v345_v23 = vpop.permute.xlu1 %344 }
  0x7a   :  { %v29_v24 = vpop.permute.xlu0 %28 }
  0x7b   :  { %3203 = vmatpush3.msk.msra.mxu1 %vm37_vm1, %v29_v24  ;;  %v32_v25 = vsel %vm30_vm2, %v27_v22, %v29_v24 }
  0x7c   :  { %3045 = vmatprep.subr.msk.mxu0 %vm37_vm1, %v32_v25  ;;  %v343_v28 = vpop.permute.xlu1 %342  ;;  %3205 = vmatmul.mubr.msk.f32.vlgmr.msra.gmra.mrb[0].mxu1 %vm33_vm3, %v3560_v26 }
  0x7d   :  { %3046 = vmatpush1.msk.msra.mxu0 %vm37_vm1, %v31_v27  ;;  %3207 = vmatprep.subr.mxu1 %v3367_v3  ;;  %v349_v35 = vsel %vm348_vm4, %v343_v28, %v345_v23 }
  0x7e   :  { %3047 = vmatmul.mubr.msk.f32.vlgmr.msra.gmra.mrb[0].mxu0 %vm33_vm3, %v3560_v26  ;;  %3050 = vmatprep.subr.msk.mxu0 %vm37_vm1, %v3408_v1  ;;  %v347_v29 = vpop.permute.xlu0 %346  ;;  %v3691_v1 = vld [vmem:[%s3854_s1 + $0x40] sm:$0xff]  ;;  %s3376_s1 = smov [#allocation2]  }
  0x7f   :  { %3051 = vmatpush1.msk.msra.mxu0 %vm37_vm1, %v3402_v0  ;;  %v350_v30 = vsel %vm348_vm4, %v345_v23, %v347_v29  ;;  %3208 = vmatpush3.msk.msra.mxu1 %vm37_vm1, %v3415_v2  ;;  %s3033_s21 = sshll.u32 %s3376_s1, 4  ;;  %s3034_s21 = int_to_ptr.vmem [resolvable:$true] %s3033_s21 }
  0x80   :  { %3056 = vmatprep.subr.msk.mxu0 %vm37_vm1, %v350_v30  ;;  %3209 = vmatprep.mubr.msk.f32.mxu1 %vm3368_vm0, %v3367_v3  ;;  %v516_v31 = vpop.permute.xlu1 %515  ;;  %s3341_s24 = scalar_lea.vmem %s3034_s21, 768  ;;  %p3346_p1 = scmp.lt.s32.totalorder %s3034_s21, %s3034_s21 }
  0x81   :  { %3212 = vmatprep.subr.mxu1 %v3367_v3  ;;  %258 = vmatprep.mubr.f32.mxu0 %v3367_v3  ;;  %p3342_p0 = scmp.ne.s32.totalorder %s3034_s21, %s3341_s24  ;;  %p3347_p2 = scmp.lt.s32.totalorder %s3341_s24, %s3341_s24 }
  0x82   :  { %3210 = vmatmul.mubr.msk.f32.vlgmr.msra.gmra.mrb[2].mxu1 %vm33_vm3, %v3585_v32  ;;  %v514_v33 = vpop.permute.xlu0 %513 }
  0x83   :  { %3213 = vmatpush3.msk.msra.mxu1 %vm37_vm1, %v347_v29  ;;  %3214 = vmatprep.mubr.msk.f32.mxu1 %vm3368_vm0, %v3367_v3  ;;  %v519_v38 = vsel %vm517_vm5, %v514_v33, %v516_v31  ;;  %p3348_p3 = por %p3347_p2, %p3346_p1 }
  0x84   :  { %3217 = vmatprep.subr.mxu1 %v3367_v3  ;;  %v683_v36 = vpop.permute.xlu1 %682 }
  0x85   :  { %p3349_p4 = pnand %p3348_p3, %p3342_p0 }
  0x86   :  { %3052 = vmatmul.mubr.msk.f32.vlgmr.msra.gmra.mrb[0].mxu0 %vm33_vm3, %v3585_v32  ;;  %v512_v40 = vpop.permute.xlu0 %511  ;;  %3215 = vmatmul.mubr.msk.f32.vlgmr.msra.gmra.mrb[4].mxu1 %vm33_vm3, %v3601_v39 }
  0x87   :  { %3057 = vmatpush1.msk.msra.mxu0 %vm37_vm1, %v349_v35  ;;  %424 = vmatprep.mubr.f32.mxu0 %v3367_v3  ;;  %v518_v44 = vsel %vm517_vm5, %v512_v40, %v514_v33 }
  0x88   :  { %3062 = vmatprep.subr.msk.mxu0 %vm37_vm1, %v519_v38  ;;  %3218 = vmatpush3.msk.msra.mxu1 %vm37_vm1, %v516_v31  ;;  %v681_v41 = vpop.permute.xlu1 %680 }
  0x89   :  { %3219 = vmatprep.mubr.msk.f32.mxu1 %vm3368_vm0, %v3367_v3  ;;  %3222 = vmatprep.subr.mxu1 %v3367_v3  ;;  %v687_v52 = vsel %vm686_vm6, %v681_v41, %v683_v36 }
  0x8a   :  { %v685_v43 = vpop.permute.xlu0 %684  ;;  %3220 = vmatmul.mubr.msk.f32.vlgmr.msra.gmra.mrb[6].mxu1 %vm33_vm3, %v3617_v42 }
  0x8b   :  { %3223 = vmatpush3.msk.msra.mxu1 %vm37_vm1, %v685_v43  ;;  %3224 = vmatprep.mubr.msk.f32.mxu1 %vm3368_vm0, %v3367_v3  ;;  %v688_v46 = vsel %vm686_vm6, %v683_v36, %v685_v43 }
  0x8c   :  { %v854_v45 = vpop.permute.xlu1 %853  ;;  %3227 = vmatprep.subr.mxu1 %v3367_v3 }
  0x8e   :  { %3058 = vmatmul.mubr.msk.f32.vlgmr.msra.gmra.mrb[0].mxu0 %vm33_vm3, %v3601_v39  ;;  %v852_v48 = vpop.permute.xlu0 %851  ;;  %3225 = vmatmul.mubr.msk.f32.vlgmr.msra.gmra.mrb[8].mxu1 %vm33_vm3, %v3630_v47 }
  0x8f   :  { %3063 = vmatpush1.msk.msra.mxu0 %vm37_vm1, %v518_v44  ;;  %593 = vmatprep.mubr.f32.mxu0 %v3367_v3  ;;  %v857_v54 = vsel %vm855_vm7, %v852_v48, %v854_v45 }
  0x90   :  { %3068 = vmatprep.subr.msk.mxu0 %vm37_vm1, %v688_v46  ;;  %v1021_v49 = vpop.permute.xlu1 %1020  ;;  %3228 = vmatpush3.msk.msra.mxu1 %vm37_vm1, %v854_v45 }
  0x91   :  { %3229 = vmatprep.mubr.msk.f32.mxu1 %vm3368_vm0, %v3367_v3  ;;  %3232 = vmatprep.subr.mxu1 %v3367_v3 }
  0x92   :  { %v850_v51 = vpop.permute.xlu0 %849  ;;  %3230 = vmatmul.mubr.msk.f32.vlgmr.msra.gmra.mrb[10].mxu1 %vm33_vm3, %v3646_v50 }
  0x93   :  { %3234 = vmatprep.mubr.msk.f32.mxu1 %vm3368_vm0, %v3367_v3  ;;  %v856_v59 = vsel %vm855_vm7, %v850_v51, %v852_v48 }
  0x94   :  { %v1019_v53 = vpop.permute.xlu1 %1018 }
  0x95   :  { %v1025_v4 = vsel %vm1024_vm8, %v1019_v53, %v1021_v49 }
  0x96   :  { %3064 = vmatmul.mubr.msk.f32.vlgmr.msra.gmra.mrb[0].mxu0 %vm33_vm3, %v3617_v42  ;;  %v1023_v55 = vpop.permute.xlu0 %1022 }
  0x97   :  { %3069 = vmatpush1.msk.msra.mxu0 %vm37_vm1, %v687_v52  ;;  %762 = vmatprep.mubr.f32.mxu0 %v3367_v3  ;;  %v1026_v62 = vsel %vm1024_vm8, %v1021_v49, %v1023_v55 }
  0x98   :  { %3074 = vmatprep.subr.msk.mxu0 %vm37_vm1, %v857_v54  ;;  %3233 = vmatpush3.msk.msra.mxu1 %vm37_vm1, %v1023_v55  ;;  %v1192_v56 = vpop.permute.xlu1 %1191 }
  0x99   :  { %3237 = vmatprep.subr.mxu1 %v3367_v3  ;;  %3235 = vmatmul.mubr.msk.f32.vlgmr.msra.gmra.mrb[12].mxu1 %vm33_vm3, %v3663_v57 }
  0x9a   :  { %v1190_v58 = vpop.permute.xlu0 %1189  ;;  %3238 = vmatpush3.msk.msra.mxu1 %vm37_vm1, %v1192_v56  ;;  %3239 = vmatprep.mubr.msk.f32.mxu1 %vm3368_vm0, %v3367_v3 }
  0x9b   :  { %3242 = vmatprep.subr.mxu1 %v3367_v3  ;;  %v1195_v6 = vsel %vm1193_vm9, %v1190_v58, %v1192_v56 }
  0x9c   :  { %v1359_v60 = vpop.permute.xlu1 %1358 }
  0x9d   :  { %3240 = vmatmul.mubr.msk.f32.vlgmr.msra.gmra.mrb[14].mxu1 %vm33_vm3, %v3676_v61 }
  0x9e   :  { %3070 = vmatmul.mubr.msk.f32.vlgmr.msra.gmra.mrb[0].mxu0 %vm33_vm3, %v3630_v47  ;;  %v1188_v63 = vpop.permute.xlu0 %1187  ;;  %3244 = vmatprep.mubr.msk.f32.mxu1 %vm3368_vm0, %v3367_v3 }
  0x9f   :  { %3075 = vmatpush1.msk.msra.mxu0 %vm37_vm1, %v856_v59  ;;  %931 = vmatprep.mubr.f32.mxu0 %v3367_v3  ;;  %v1194_v10 = vsel %vm1193_vm9, %v1188_v63, %v1190_v58 }
  0xa0   :  { %3080 = vmatprep.subr.msk.mxu0 %vm37_vm1, %v1026_v62  ;;  %v1357_v0 = vpop.permute.xlu1 %1356 }
  0xa1   :  { %v1363_v18 = vsel %vm1362_vm10, %v1357_v0, %v1359_v60 }
  0xa2   :  { %v1361_v2 = vpop.permute.xlu0 %1360 }
  0xa3   :  { %3243 = vmatpush3.msk.msra.mxu1 %vm37_vm1, %v1361_v2  ;;  %v1364_v15 = vsel %vm1362_vm10, %v1359_v60, %v1361_v2 }
  0xa4   :  { %v1546_v5 = vpop.permute.xlu1 %1545  ;;  %3247 = vmatprep.subr.mxu1 %v3367_v3  ;;  %3245 = vmatmul.mubr.msk.f32.vlgmr.msra.gmra.mrb[16].mxu1 %vm33_vm3, %v3691_v1 }
  0xa5   :  { %3248 = vmatpush3.msk.msra.mxu1 %vm37_vm1, %v1546_v5  ;;  %3249 = vmatprep.mubr.msk.f32.mxu1 %vm3368_vm0, %v3367_v3 }
  0xa6   :  { %3076 = vmatmul.mubr.msk.f32.vlgmr.msra.gmra.mrb[0].mxu0 %vm33_vm3, %v3646_v50  ;;  %v1544_v7 = vpop.permute.xlu0 %1543  ;;  %3252 = vmatprep.subr.mxu1 %v3367_v3 }
  0xa7   :  { %3081 = vmatpush1.msk.msra.mxu0 %vm37_vm1, %v1025_v4  ;;  %1100 = vmatprep.mubr.f32.mxu0 %v3367_v3  ;;  %v1548_v20 = vsel %vm30_vm2, %v1544_v7, %v1546_v5 }
  0xa8   :  { %3086 = vmatprep.subr.msk.mxu0 %vm37_vm1, %v1195_v6  ;;  %v3708_v8 = vpop.permute.xlu1 %1857  ;;  %3250 = vmatmul.mubr.msk.f32.vlgmr.msra.gmra.mrb[18].mxu1 %vm33_vm3, %v3560_v26 }
  0xa9   :  { %3253 = vmatpush3.msk.msra.mxu1 %vm37_vm1, %v3486_v12  ;;  %3254 = vmatprep.mubr.msk.f32.mxu1 %vm3368_vm0, %v3367_v3 }
  0xaa   :  { %v1542_v9 = vpop.permute.xlu0 %1541  ;;  %3257 = vmatprep.subr.mxu1 %v3367_v3 }
  0xab   :  { %v1547_v24 = vsel %vm30_vm2, %v1542_v9, %v1544_v7 }
  0xac   :  { %v1856_v14 = vpop.permute.xlu1 %1855  ;;  %3255 = vmatmul.mubr.msk.f32.vlgmr.msra.gmra.mrb[20].mxu1 %vm33_vm3, %v3585_v32 }
  0xad   :  { %3259 = vmatprep.mubr.msk.f32.mxu1 %vm3368_vm0, %v3367_v3  ;;  %v1861_v33 = vsel %vm348_vm4, %v1856_v14, %v3708_v8 }
  0xae   :  { %3082 = vmatmul.mubr.msk.f32.vlgmr.msra.gmra.mrb[0].mxu0 %vm33_vm3, %v3663_v57  ;;  %v1860_v12 = vpop.permute.xlu0 %1859 }
  0xaf   :  { %3087 = vmatpush1.msk.msra.mxu0 %vm37_vm1, %v1194_v10  ;;  %1269 = vmatprep.mubr.f32.mxu0 %v3367_v3  ;;  %v1862_v29 = vsel %vm348_vm4, %v3708_v8, %v1860_v12 }
  0xb0   :  { %3092 = vmatprep.subr.msk.mxu0 %vm37_vm1, %v1364_v15  ;;  %3258 = vmatpush3.msk.msra.mxu1 %vm37_vm1, %v1860_v12  ;;  %v2027_v16 = vpop.permute.xlu1 %2026 }
  0xb1   :  { %3262 = vmatprep.subr.mxu1 %v3367_v3  ;;  %3260 = vmatmul.mubr.msk.f32.vlgmr.msra.gmra.mrb[22].mxu1 %vm33_vm3, %v3601_v39 }
  0xb2   :  { %v2025_v17 = vpop.permute.xlu0 %2024  ;;  %3263 = vmatpush3.msk.msra.mxu1 %vm37_vm1, %v2027_v16  ;;  %3264 = vmatprep.mubr.msk.f32.mxu1 %vm3368_vm0, %v3367_v3 }
  0xb3   :  { %3267 = vmatprep.subr.mxu1 %v3367_v3 }
  0xb4   :  { %v2192_v19 = vpop.permute.xlu1 %2191 }
  0xb5   :  { %3265 = vmatmul.mubr.msk.f32.vlgmr.msra.gmra.mrb[24].mxu1 %vm33_vm3, %v3617_v42 }
  0xb6   :  { %3088 = vmatmul.mubr.msk.f32.vlgmr.msra.gmra.mrb[0].mxu0 %vm33_vm3, %v3676_v61  ;;  %v2023_v21 = vpop.permute.xlu0 %2022  ;;  %3269 = vmatprep.mubr.msk.f32.mxu1 %vm3368_vm0, %v3367_v3 }
  0xb7   :  { %3093 = vmatpush1.msk.msra.mxu0 %vm37_vm1, %v1363_v18  ;;  %1438 = vmatprep.mubr.f32.mxu0 %v3367_v3  ;;  %v2028_v36 = vsel %vm517_vm5, %v2023_v21, %v2025_v17 }
  0xb8   :  { %3100 = vmatprep.subr.msk.mxu0 %vm37_vm1, %v1548_v20  ;;  %v2190_v22 = vpop.permute.xlu1 %2189 }
  0xb9   :  { %v2195_v38 = vsel %vm686_vm6, %v2190_v22, %v2192_v19 }
  0xba   :  { %v2194_v23 = vpop.permute.xlu0 %2193 }
  0xbb   :  { %3268 = vmatpush3.msk.msra.mxu1 %vm37_vm1, %v2194_v23 }
  0xbc   :  { %v2361_v25 = vpop.permute.xlu1 %2360  ;;  %3270 = vmatmul.mubr.msk.f32.vlgmr.msra.gmra.mrb[26].mxu1 %vm33_vm3, %v3630_v47  ;;  %3272 = vmatprep.subr.mxu1 %v3367_v3 }
  0xbd   :  { %3273 = vmatpush3.msk.msra.mxu1 %vm37_vm1, %v2361_v25  ;;  %3274 = vmatprep.mubr.msk.f32.mxu1 %vm3368_vm0, %v3367_v3 }
  0xbe   :  { %3094 = vmatmul.mubr.msk.f32.vlgmr.msra.gmra.mrb[0].mxu0 %vm33_vm3, %v3691_v1  ;;  %v2359_v27 = vpop.permute.xlu0 %2358  ;;  %3277 = vmatprep.subr.mxu1 %v3367_v3 }
  0xbf   :  { %3101 = vmatpush1.msk.msra.mxu0 %vm37_vm1, %v1547_v24  ;;  %1622 = vmatprep.mubr.f32.mxu0 %v3367_v3  ;;  %v2363_v40 = vsel %vm855_vm7, %v2359_v27, %v2361_v25 }
  0xc0   :  { %3105 = vmatprep.subr.msk.mxu0 %vm37_vm1, %v3491_v13  ;;  %v2526_v28 = vpop.permute.xlu1 %2525  ;;  %3275 = vmatmul.mubr.msk.f32.vlgmr.msra.gmra.mrb[28].mxu1 %vm33_vm3, %v3646_v50 }
  0xc1   :  { %3279 = vmatprep.mubr.msk.f32.mxu1 %vm3368_vm0, %v3367_v3 }
  0xc2   :  { %3102 = vmatmul.mubr.msk.f32.vlgmr.msra.gmra.mrb[2].mxu0 %vm33_vm3, %v3560_v26  ;;  %v2357_v30 = vpop.permute.xlu0 %2356  ;;  %v2029_v26 = vsel %vm517_vm5, %v2025_v17, %v2027_v16 }
  0xc3   :  { %3106 = vmatpush1.msk.msra.mxu0 %vm37_vm1, %v3479_v11  ;;  %1772 = vmatprep.mubr.f32.mxu0 %v3367_v3 }
  0xc4   :  { %3113 = vmatprep.subr.msk.mxu0 %vm37_vm1, %v1862_v29  ;;  %v2524_v13 = vpop.permute.xlu1 %2523 }
  0xc6   :  { %v2528_v31 = vpop.permute.xlu0 %2527 }
  0xc7   :  { %3278 = vmatpush3.msk.msra.mxu1 %vm37_vm1, %v2528_v31  ;;  %v2530_v41 = vsel %vm1024_vm8, %v2526_v28, %v2528_v31 }
  0xc8   :  { %3280 = vmatmul.mubr.msk.f32.vlgmr.msra.gmra.mrb[30].mxu1 %vm33_vm3, %v3663_v57  ;;  %v2695_v34 = vpop.permute.xlu1 %2694  ;;  %3282 = vmatprep.subr.mxu1 %v3367_v3 }
  0xc9   :  { %3283 = vmatpush3.msk.msra.mxu1 %vm37_vm1, %v2695_v34  ;;  %3284 = vmatprep.mubr.msk.f32.mxu1 %vm3368_vm0, %v3367_v3 }
  0xca   :  { %3107 = vmatmul.mubr.msk.f32.vlgmr.msra.gmra.mrb[2].mxu0 %vm33_vm3, %v3585_v32  ;;  %v2693_v11 = vpop.permute.xlu0 %2692  ;;  %3287 = vmatprep.subr.mxu1 %v3367_v3  ;;  %v2196_v32 = vsel %vm686_vm6, %v2192_v19, %v2194_v23 }
  0xcb   :  { %3114 = vmatpush1.msk.msra.mxu0 %vm37_vm1, %v1861_v33  ;;  %1936 = vmatprep.mubr.f32.mxu0 %v3367_v3  ;;  %v2697_v43 = vsel %vm1193_vm9, %v2693_v11, %v2695_v34 }
  0xcc   :  { %3121 = vmatprep.subr.msk.mxu0 %vm37_vm1, %v2029_v26  ;;  %3285 = vmatmul.mubr.msk.f32.vlgmr.msra.gmra.mrb[32].mxu1 %vm33_vm3, %v3676_v61  ;;  %v2860_v44 = vpop.permute.xlu1 %2859 }
  0xcd   :  { %3289 = vmatprep.mubr.msk.f32.mxu1 %vm3368_vm0, %v3367_v3 }
  0xce   :  { %v2691_v35 = vpop.permute.xlu0 %2690 }
  0xcf   :  { %v2696_v45 = vsel %vm1193_vm9, %v2691_v35, %v2693_v11 }
  0xd2   :  { %3115 = vmatmul.mubr.msk.f32.vlgmr.msra.gmra.mrb[2].mxu0 %vm33_vm3, %v3601_v39  ;;  %v2862_v37 = vpop.permute.xlu0 %2861  ;;  %v2362_v39 = vsel %vm855_vm7, %v2357_v30, %v2359_v27 }
  0xd3   :  { %3122 = vmatpush1.msk.msra.mxu0 %vm37_vm1, %v2028_v36  ;;  %2103 = vmatprep.mubr.f32.mxu0 %v3367_v3  ;;  %v2864_v46 = vsel %vm1362_vm10, %v2860_v44, %v2862_v37 }
  0xd4   :  { %3129 = vmatprep.subr.msk.mxu0 %vm37_vm1, %v2196_v32  ;;  %3288 = vmatpush3.msk.msra.mxu1 %vm37_vm1, %v2862_v37 }
  0xd5   :  { %3290 = vmatmul.mubr.msk.f32.vlgmr.msra.gmra.mrb[34].mxu1 %vm33_vm3, %v3691_v1 }
  0xda   :  { %3123 = vmatmul.mubr.msk.f32.vlgmr.msra.gmra.mrb[2].mxu0 %vm33_vm3, %v3617_v42  ;;  %v2529_v42 = vsel %vm1024_vm8, %v2524_v13, %v2526_v28 }
  0xdb   :  { %3130 = vmatpush1.msk.msra.mxu0 %vm37_vm1, %v2195_v38  ;;  %2270 = vmatprep.mubr.f32.mxu0 %v3367_v3 }
  0xdc   :  { %3137 = vmatprep.subr.msk.mxu0 %vm37_vm1, %v2363_v40 }
  0xe2   :  { %3131 = vmatmul.mubr.msk.f32.vlgmr.msra.gmra.mrb[2].mxu0 %vm33_vm3, %v3630_v47  ;;  %v2858_v47 = vpop.permute.xlu1 %2857 }
  0xe3   :  { %3138 = vmatpush1.msk.msra.mxu0 %vm37_vm1, %v2362_v39  ;;  %2437 = vmatprep.mubr.f32.mxu0 %v3367_v3  ;;  %v2863_v48 = vsel %vm1362_vm10, %v2858_v47, %v2860_v44  ;;  %v1521_v14 = vpop.permute.xlu0 %1520 }
  0xe4   :  { %3145 = vmatprep.subr.msk.mxu0 %vm37_vm1, %v2530_v41 }
  0xea   :  { %3139 = vmatmul.mubr.msk.f32.vlgmr.msra.gmra.mrb[2].mxu0 %vm33_vm3, %v3646_v50 }
  0xeb   :  { %3146 = vmatpush1.msk.msra.mxu0 %vm37_vm1, %v2529_v42  ;;  %2604 = vmatprep.mubr.f32.mxu0 %v3367_v3 }
  0xec   :  { %3153 = vmatprep.subr.msk.mxu0 %vm37_vm1, %v2697_v43 }
  0xf2   :  { %3147 = vmatmul.mubr.msk.f32.vlgmr.msra.gmra.mrb[2].mxu0 %vm33_vm3, %v3663_v57 }
  0xf3   :  { %3154 = vmatpush1.msk.msra.mxu0 %vm37_vm1, %v2696_v45  ;;  %2771 = vmatprep.mubr.f32.mxu0 %v3367_v3 }
  0xf4   :  { %3161 = vmatprep.subr.msk.mxu0 %vm37_vm1, %v2864_v46 }
  0xfa   :  { %3155 = vmatmul.mubr.msk.f32.vlgmr.msra.gmra.mrb[2].mxu0 %vm33_vm3, %v3676_v61 }
  0xfb   :  { %3162 = vmatpush1.msk.msra.mxu0 %vm37_vm1, %v2863_v48  ;;  %2938 = vmatprep.mubr.f32.mxu0 %v3367_v3 }
 0x102   :  { %3163 = vmatmul.mubr.msk.f32.vlgmr.msra.gmra.mrb[2].mxu0 %vm33_vm3, %v3691_v1 }
 0x14f   :  { %v181_v49 = vpop.f32.mrb[0].mxu1 }
 0x150   :  { %v3206_v50 = vpop.f32.mrb[1].mxu1 }
 0x155   :  { %v331_v51 = vpop.f32.mrb[2].mxu1 }
 0x156   :  { %v332_v52 = vadd.f32 %v331_v51, %v181_v49  ;;  %v3211_v53 = vpop.f32.mrb[3].mxu1 }
 0x159   :  { %v497_v54 = vpop.f32.mrb[4].mxu1 }
 0x15a   :  { %v503_v55 = vadd.f32 %v497_v54, %v332_v52  ;;  %v3216_v56 = vpop.f32.mrb[5].mxu1 }
 0x15d   :  { %v666_v57 = vpop.f32.mrb[6].mxu1 }
 0x15e   :  { %v672_v58 = vadd.f32 %v666_v57, %v503_v55  ;;  %v3221_v59 = vpop.f32.mrb[7].mxu1 }
 0x161   :  { %v835_v60 = vpop.f32.mrb[8].mxu1 }
 0x162   :  { %v841_v61 = vadd.f32 %v835_v60, %v672_v58  ;;  %v3226_v62 = vpop.f32.mrb[9].mxu1 }
 0x165   :  { %v1004_v63 = vpop.f32.mrb[10].mxu1 }
 0x166   :  { %v1010_v0 = vadd.f32 %v1004_v63, %v841_v61  ;;  %v3231_v3 = vpop.f32.mrb[11].mxu1 }
 0x16c   :  { %v1173_v2 = vpop.f32.mrb[12].mxu1 }
 0x16d   :  { %v1179_v4 = vadd.f32 %v1173_v2, %v1010_v0  ;;  %v3236_v1 = vpop.f32.mrb[13].mxu1 }
 0x170   :  { %v1342_v5 = vpop.f32.mrb[14].mxu1 }
 0x171   :  { %v1348_v6 = vadd.f32 %v1342_v5, %v1179_v4  ;;  %v3241_v7 = vpop.f32.mrb[15].mxu1 }
 0x177   :  { %v1511_v8 = vpop.f32.mrb[16].mxu1 }
 0x178   :  { %v1517_v9 = vadd.f32 %v1511_v8, %v1348_v6  ;;  %v3246_v10 = vpop.f32.mrb[17].mxu1 }
 0x17a   :  { %v1525_v15 = vadd.f32 %v1521_v14, %v1517_v9 }
 0x17b   :  { %v1695_v12 = vpop.f32.mrb[18].mxu1 }
 0x17c   :  { %v1528_v16 = vmax.f32 %v1525_v15, 0.0  ;;  %v3251_v17 = vpop.f32.mrb[19].mxu1 }
 0x17e   :  { %1532 = vst.msk [vmem:[#allocation2 + $0x10] sm:$0xff] %vm1531_vm11, %v1528_v16 }
 0x17f   :  { %v1845_v18 = vpop.f32.mrb[20].mxu1 }
 0x180   :  { %v1846_v19 = vadd.f32 %v1845_v18, %v1695_v12  ;;  %v3256_v20 = vpop.f32.mrb[21].mxu1 }
 0x184   :  { %v2009_v21 = vpop.f32.mrb[22].mxu1 }
 0x185   :  { %v2015_v22 = vadd.f32 %v2009_v21, %v1846_v19  ;;  %v3261_v23 = vpop.f32.mrb[23].mxu1 }
 0x188   :  { %v2176_v24 = vpop.f32.mrb[24].mxu1 }
 0x189   :  { %v2182_v25 = vadd.f32 %v2176_v24, %v2015_v22  ;;  %v3266_v27 = vpop.f32.mrb[25].mxu1 }
 0x18f   :  { %v2343_v28 = vpop.f32.mrb[26].mxu1 }
 0x190   :  { %v2349_v29 = vadd.f32 %v2343_v28, %v2182_v25  ;;  %v3271_v30 = vpop.f32.mrb[27].mxu1 }
 0x191   :  { %v1440_v13 = vpop.f32.mrb[0].mxu0 }
 0x192   :  { %v1523_v31 = vadd.f32 %v1521_v14, %v1440_v13  ;;  %v1442_v33 = vpop.f32.mrb[1].mxu0 }
 0x193   :  { %v1524_v34 = vadd.f32 %v1521_v14, %v1442_v33  ;;  %v2510_v26 = vpop.f32.mrb[28].mxu1 }
 0x194   :  { %v1526_v11 = vmax.f32 %v1523_v31, 0.0  ;;  %v2516_v35 = vadd.f32 %v2510_v26, %v2349_v29  ;;  %v3276_v36 = vpop.f32.mrb[29].mxu1 }
 0x195   :  { %v1527_v32 = vmax.f32 %v1524_v34, 0.0 }
 0x196   :  { %1529 = vst [vmem:[#allocation2] sm:$0xff] %v1526_v11 }
 0x197   :  { %1530 = vst [vmem:[#allocation2 + $0x8] sm:$0xff] %v1527_v32 }
 0x19b   :  { %v2677_v37 = vpop.f32.mrb[30].mxu1 }
 0x19c   :  { %v2683_v38 = vadd.f32 %v2677_v37, %v2516_v35  ;;  %v3281_v40 = vpop.f32.mrb[31].mxu1 }
 0x19f   :  { %v2844_v39 = vpop.f32.mrb[32].mxu1 }
 0x1a0   :  { %v2850_v41 = vadd.f32 %v2844_v39, %v2683_v38  ;;  %v3286_v42 = vpop.f32.mrb[33].mxu1 }
 0x1a8   :  { %v3011_v43 = vpop.f32.mrb[34].mxu1 }
 0x1a9   :  { %v3017_v44 = vadd.f32 %v3011_v43, %v2850_v41  ;;  %v3291_v45 = vpop.f32.mrb[35].mxu1 }
 0x1ab   :  { %v3020_v46 = vadd.f32 %v3017_v44, %v1521_v14 }
 0x1ad   :  { %v3023_v47 = vmax.f32 %v3020_v46, 0.0 }
 0x1af   :  { %3027 = vst.msk [vmem:[#allocation2 + $0x28] sm:$0xff] %vm1531_vm11, %v3023_v47 }
 0x1d5   :  { %v2940_v48 = vpop.f32.mrb[2].mxu0 }
 0x1d6   :  { %v3018_v49 = vadd.f32 %v2940_v48, %v1521_v14  ;;  %v2942_v50 = vpop.f32.mrb[3].mxu0 }
 0x1d7   :  { %v3019_v51 = vadd.f32 %v2942_v50, %v1521_v14 }
 0x1d8   :  { %v3021_v52 = vmax.f32 %v3018_v49, 0.0 }
 0x1d9   :  { %v3022_v53 = vmax.f32 %v3019_v51, 0.0 }
 0x1da   :  { %3025 = vst [vmem:[#allocation2 + $0x18] sm:$0xff] %v3021_v52 }
 0x1db   :  { %3026 = vst [vmem:[#allocation2 + $0x20] sm:$0xff] %v3022_v53 }
 0x1dc   :  { %3352 = shalt.err (!%p3349_p4)
}
 0x1dd   :  { %s3353_s25 = scalar_lea.hbm %s3856_s3, 768 }
 0x1de   :  { %p3354_p5 = scmp.ne.s32.totalorder %s3856_s3, %s3353_s25  ;;  %p3357_p6 = scmp.lt.u32.totalorder %s3353_s25, %s3856_s3 }
 0x1e0   :  { %p3359_p7 = pnand %p3357_p6, %p3354_p5 }
 0x1e2   :  { %3362 = shalt.err (!%p3359_p7)
}
 0x1e3   :  { %s3377_s29 = smov 384   ;;  %s3378_s30 = smov 24  }
 0x1e4   :  { %3039 = dma.vmem_to_hbm [thread:$0]  %s3034_s21, 768, %s3856_s3, [#allocation3], %s3377_s29, %s3377_s29, %s3378_s30  }
 0x1e5   :  { %3363 = dma.done.wait [#allocation3], 768  }
 0x1e6   :  { %3364 = vsyncadd [#allocation3], 4294966528 }
 0x1e7   :  { %3043 = vsyncpa [#allocation3], 1 }

</bundles_post_ra>
